<compile_context>
chip_gen: v7x
topology: tpu7x:2x2x1
jax: 0.10.0
libtpu: 0.0.40
codegen_flags: <defaults>
</compile_context>

<pallas_src>
import functools
import math

import jax
import jax.numpy as jnp
from jax.experimental import pallas as pl
from jax.experimental.pallas import tpu as pltpu


def _pe_add_kernel(x_ref, o_ref, *, pos, dim):
    """x_ref/o_ref: (TS, D) f32 tile of inputs[B-1]; adds posEnc(B-1) row."""
    lanes = x_ref.shape[-1]
    # Single-row iota along the lane (embedding) axis — PE depends only on i.
    i_i = jax.lax.broadcasted_iota(jnp.int32, (1, lanes), 1)
    i_f = i_i.astype(jnp.float32)
    # angle = pos / 10000 ** (2*i/D)  ==  pos * exp(-(2*i/D) * ln(10000))
    angle = jnp.float32(pos) * jnp.exp(i_f * jnp.float32(-2.0 * math.log(10000.0) / dim))
    # even dims -> sin, odd dims -> cos (bitwise parity test, one tiny row)
    pe_row = jnp.where((i_i & 1) == 0, jnp.sin(angle), jnp.cos(angle))  # (1, D) f32
    # Streaming broadcast-add; this is the only O(S*D) work in the kernel.
    o_ref[...] = x_ref[...] + pe_row


def _choose_seq_tile(S, D, itemsize, target_bytes=2 * 1024 * 1024):
    """Largest multiple-of-8 divisor of S with tile <= ~2 MiB (or full S)."""
    max_rows = max(8, target_bytes // max(1, D * itemsize))
    if S <= max_rows:
        return S
    ts = (max_rows // 8) * 8
    while ts >= 8:
        if S % ts == 0:
            return ts
        ts -= 8
    return S  # fallback: full-extent block


def positional_encoding_forward(inputs):
    """inputs: [B, S, D] float32 -> output: [S, D] float32 (= inputs[-1] + posEnc(B-1))."""
    B, S, D = inputs.shape
    inputs = inputs.astype(jnp.float32)  # module returns FloatTensor math
    pos = float(B - 1)

    ts = _choose_seq_tile(S, D, jnp.dtype(jnp.float32).itemsize)
    grid = (S // ts,)

    kernel = functools.partial(_pe_add_kernel, pos=pos, dim=float(D))

    return pl.pallas_call(
        kernel,
        out_shape=jax.ShapeDtypeStruct((S, D), jnp.float32),
        grid=grid,
        in_specs=[
            # Squeezed batch dim: index_map statically selects batch B-1, so the
            # kernel streams inputs[B-1] straight from HBM (no host-side slice).
            pl.BlockSpec((None, ts, D), lambda s: (B - 1, s, 0)),
        ],
        out_specs=pl.BlockSpec((ts, D), lambda s: (s, 0)),
        compiler_params=pltpu.CompilerParams(
            dimension_semantics=("parallel",),
        ),
    )(inputs)


def _reference(inputs):
    """Pure-JAX reference mirroring the PyTorch module exactly."""
    B, S, D = inputs.shape
    pos = float(B - 1)
    i = jnp.arange(D, dtype=jnp.float32)
    angle = pos / jnp.power(jnp.float32(10000.0), 2.0 * i / jnp.float32(D))
    pe = jnp.where((jnp.arange(D) % 2) == 0, jnp.sin(angle), jnp.cos(angle))
    return inputs[B - 1].astype(jnp.float32) + pe[None, :]


if __name__ == "__main__":
    key = jax.random.PRNGKey(0)
    B, S, D = 2, 8, 32  # batch (position axis), seq, embedding_dim
    inputs = jax.random.normal(key, (B, S, D), dtype=jnp.float32)

    out = positional_encoding_forward(inputs)
    out = jax.block_until_ready(out)

    ref = _reference(inputs)
    assert out.shape == (S, D)
    assert jnp.allclose(out, ref, atol=1e-5, rtol=1e-5), "mismatch vs reference"

    print("KERNEL_OK")
</pallas_src>

<mosaic_0001>
module attributes {stable_mosaic.version = 11 : i64} {
  func.func @_pe_add_kernel(%arg0: i32, %arg1: memref<1x8x32xf32, #tpu.memory_space<vmem>>, %arg2: memref<8x32xf32, #tpu.memory_space<vmem>>) attributes {dimension_semantics = [#tpu.dimension_semantics<parallel>], iteration_bounds = array<i64: 1>, scalar_prefetch = 0 : i64, scratch_operands = 0 : i64, tpu.core_type = #tpu.core_type<tc>, window_params = [{transform_indices = @transform_0, window_bounds = array<i64: 1, 8, 32>}, {transform_indices = @transform_1, window_bounds = array<i64: 8, 32>}]} {
    %0 = tpu.iota {dimensions = array<i32: 1>} : vector<1x32xi32>
    %1 = arith.sitofp %0 : vector<1x32xi32> to vector<1x32xf32>
    %cst = arith.constant -0.575646281 : f32
    %2 = vector.broadcast %cst : f32 to vector<1x32xf32>
    %3 = arith.mulf %1, %2 : vector<1x32xf32>
    %4 = math.exp %3 : vector<1x32xf32>
    %cst_0 = arith.constant 1.000000e+00 : f32
    %5 = vector.broadcast %cst_0 : f32 to vector<1x32xf32>
    %6 = arith.mulf %5, %4 : vector<1x32xf32>
    %c1_i32 = arith.constant 1 : i32
    %7 = vector.broadcast %c1_i32 : i32 to vector<1x32xi32>
    %8 = arith.andi %0, %7 : vector<1x32xi32>
    %c0_i32 = arith.constant 0 : i32
    %9 = vector.broadcast %c0_i32 : i32 to vector<1x32xi32>
    %10 = arith.cmpi eq, %8, %9 : vector<1x32xi32>
    %11 = math.sin %6 : vector<1x32xf32>
    %12 = math.cos %6 : vector<1x32xf32>
    %13 = arith.select %10, %11, %12 : vector<1x32xi1>, vector<1x32xf32>
    %c0 = arith.constant 0 : index
    %c0_1 = arith.constant 0 : index
    %c0_2 = arith.constant 0 : index
    %14 = vector.load %arg1[%c0, %c0_1, %c0_2] : memref<1x8x32xf32, #tpu.memory_space<vmem>>, vector<1x8x32xf32>
    %15 = vector.shape_cast %14 : vector<1x8x32xf32> to vector<8x32xf32>
    %16 = vector.broadcast %13 : vector<1x32xf32> to vector<8x32xf32>
    %17 = arith.addf %15, %16 : vector<8x32xf32>
    %c0_3 = arith.constant 0 : index
    %c0_4 = arith.constant 0 : index
    %18 = vector.load %arg2[%c0_3, %c0_4] : memref<8x32xf32, #tpu.memory_space<vmem>>, vector<8x32xf32>
    tpu.vector_store %arg2[%c0_3, %c0_4], %17 {strides = array<i32>} : memref<8x32xf32, #tpu.memory_space<vmem>>, vector<8x32xf32>,
    return
  }
  func.func @transform_0(%arg0: i32) -> (i32, i32, i32) {
    %c1_i32 = arith.constant 1 : i32
    %c0_i32 = arith.constant 0 : i32
    %c0_i32_0 = arith.constant 0 : i32
    return %c1_i32, %arg0, %c0_i32 : i32, i32, i32
  }
  func.func @transform_1(%arg0: i32) -> (i32, i32) {
    %c0_i32 = arith.constant 0 : i32
    %c0_i32_0 = arith.constant 0 : i32
    return %arg0, %c0_i32 : i32, i32
  }
}

</mosaic_0001>

<bundles_post_ra>
// kernel: tpu_custom_call.1
= control target key start
LH: loop header
LB: loop body
LE: loop exit
PB: predicated region body
PF: predicated region fallthrough
CT: control target
= control target key end

     0   :  { %6 = vsyncpa [#allocation3], 0  ;;  %s398_s0 = inlined_call_operand.hbm [shape: f32[2,8,32], index: 0, kind: input, shape index: {}]   ;;  %s399_s1 = inlined_call_operand.hbm [shape: f32[8,32], index: 1, kind: output, shape index: {}]  }
   0x1   :  { %7 = vsyncpa [#allocation4], 0  ;;  %s13_s8 = scalar_lea.hbm %s398_s0, 128  ;;  %s334_s9 = smov [#allocation2]  }
   0x2   :  { %s15_s10 = sshll.u32 %s334_s9, 4  ;;  %s307_s13 = scalar_lea.hbm %s398_s0, 256  ;;  %s16_s10 = int_to_ptr.vmem [resolvable:$true] %s15_s10 }
   0x3   :  { %p284_p0 = scmp.ne.s32.totalorder %s13_s8, %s307_s13  ;;  %p286_p1 = scmp.lt.u32.totalorder %s13_s8, %s398_s0 }
   0x4   :  { %p287_p2 = scmp.lt.u32.totalorder %s307_s13, %s307_s13  ;;  %p289_p4 = scmp.lt.u32.totalorder %s307_s13, %s13_s8 }
   0x6   :  { %p288_p3 = por %p287_p2, %p286_p1 }
   0x8   :  { %p290_p5 = por %p289_p4, %p288_p3 }
   0xa   :  { %p291_p6 = pnand %p290_p5, %p284_p0 }
   0xc   :  { %294 = shalt.err (!%p291_p6)
}
   0xd   :  { %s295_s16 = scalar_lea.vmem %s16_s10, 128  ;;  %p300_p8 = scmp.lt.s32.totalorder %s16_s10, %s16_s10 }
   0xe   :  { %p296_p7 = scmp.ne.s32.totalorder %s16_s10, %s295_s16  ;;  %p301_p9 = scmp.lt.s32.totalorder %s295_s16, %s295_s16 }
  0x10   :  { %p302_p10 = por %p301_p9, %p300_p8 }
  0x12   :  { %p303_p11 = pnand %p302_p10, %p296_p7 }
  0x14   :  { %306 = shalt.err (!%p303_p11)
}
  0x15   :  { %18 = dma.hbm_to_vmem [thread:$0]  %s13_s8, 128, %s16_s10, [#allocation3]  }
  0x16   :  { %330 = dma.done.wait [#allocation3], 128  }
  0x17   :  { %331 = vsyncadd [#allocation3], 4294967168  ;;  %v22_v0 = vlaneseq  ;;  %v335_v17 = vmov 683565275   ;;  %v336_v19 = vmov 2475754826  }
  0x18   :  { %v337_v21 = vmov 2131351028   ;;  %v338_v23 = vmov 2102212464   ;;  %v339_v25 = vmov 920167782  }
  0x19   :  { %v361_v1 = vand.u32 127, %v22_v0  ;;  %v340_v32 = vmov 1326507024   ;;  %s341_s0 = smov [#allocation5]  }
  0x1a   :  { %s248_s17 = sshll.u32 %s341_s0, 4  ;;  %s249_s17 = int_to_ptr.vmem [resolvable:$true] %s248_s17 }
  0x1b   :  { %v24_v2 = vcvt.s32.f32 %v361_v1  ;;  %s308_s18 = scalar_lea.vmem %s249_s17, 128  ;;  %p313_p13 = scmp.lt.s32.totalorder %s249_s17, %s249_s17 }
  0x1c   :  { %p309_p12 = scmp.ne.s32.totalorder %s249_s17, %s308_s18  ;;  %p314_p0 = scmp.lt.s32.totalorder %s308_s18, %s308_s18 }
  0x1d   :  { %v25_v3 = vmul.f32 -0.5756463, %v24_v2 }
  0x1e   :  { %p315_p1 = por %p314_p0, %p313_p13 }
  0x1f   :  { %v26_v4 = vmul.f32 1.442695, %v25_v3 }
  0x20   :  { %p316_p2 = pnand %p315_p1, %p309_p12 }
  0x21   :  { %277 = vpow2.f32 %v26_v4 }
  0x2b   :  { %v364_v5 = vpop.eup %277 }
  0x2c   :  { %v33_v6 = vand.u32 2139095040, %v364_v5  ;;  %v30_v8 = vand.u32 2147483647, %v364_v5  ;;  %vm32_vm7 = vcmp.lt.s32.totalorder %v364_v5, 0  ;;  %vm122_vm15 = vweird.f32 %v364_v5 }
  0x2e   :  { %v34_v7 = vshrl.u32 %v33_v6, 23  ;;  %v37_v11 = vand.u32 8388607, %v30_v8  ;;  %vm31_vm8 = vcmp.le.f32.partialorder %v30_v8, 0.7853982 }
  0x30   :  { %v257_v9 = vadd.s32 4294967169, %v34_v7  ;;  %v38_v14 = vor.u32 8388608, %v37_v11 }
  0x32   :  { %v40_v10 = vadd.s32 1, %v257_v9  ;;  %v78_v34 = vshll.u32 %v38_v14, 8 }
  0x34   :  { %vm41_vm0 = vcmp.gt.s32.totalorder %v40_v10, 0 }
  0x35   :  { %v42_v12 = vsel %vm41_vm0, %v40_v10, 0 }
  0x36   :  { %v44_v13 = vand.u32 31, %v42_v12  ;;  %v43_v15 = vshrl.u32 %v42_v12, 5 }
  0x38   :  { %v45_v16 = vsub.s32 32, %v44_v13  ;;  %v47_v18 = vshll.u32 %v335_v17, %v44_v13  ;;  %v50_v20 = vshll.u32 %v336_v19, %v44_v13  ;;  %v53_v22 = vshll.u32 %v337_v21, %v44_v13 }
  0x39   :  { %v56_v24 = vshll.u32 %v338_v23, %v44_v13  ;;  %v59_v26 = vshll.u32 %v339_v25, %v44_v13  ;;  %vm62_vm1 = vcmp.lt.s32.totalorder %v43_v15, 1  ;;  %vm65_vm2 = vcmp.lt.s32.totalorder %v43_v15, 4 }
  0x3a   :  { %v46_v27 = vshrl.u32 %v335_v17, %v45_v16  ;;  %v48_v28 = vshrl.u32 %v336_v19, %v45_v16  ;;  %v51_v29 = vshrl.u32 %v337_v21, %v45_v16  ;;  %v54_v30 = vshrl.u32 %v338_v23, %v45_v16 }
  0x3b   :  { %v57_v31 = vshrl.u32 %v339_v25, %v45_v16  ;;  %v60_v33 = vshrl.u32 %v340_v32, %v45_v16  ;;  %vm63_vm3 = vcmp.lt.s32.totalorder %v43_v15, 2  ;;  %vm64_vm4 = vcmp.lt.s32.totalorder %v43_v15, 3 }
  0x3c   :  { %v49_v35 = vor.u32 %v48_v28, %v47_v18  ;;  %v52_v36 = vor.u32 %v51_v29, %v50_v20  ;;  %v55_v37 = vor.u32 %v54_v30, %v53_v22  ;;  %v28_v30 = vand.u32 1, %v361_v1 }
  0x3d   :  { %v58_v38 = vor.u32 %v57_v31, %v56_v24  ;;  %v61_v39 = vor.u32 %v60_v33, %v59_v26 }
  0x3e   :  { %v66_v40 = vsel %vm62_vm1, %v46_v27, %v49_v35  ;;  %v67_v41 = vsel %vm65_vm2, %v55_v37, 2102212464  ;;  %v70_v42 = vsel %vm62_vm1, %v49_v35, %v52_v36  ;;  %v74_v43 = vsel %vm62_vm1, %v52_v36, %v55_v37 }
  0x3f   :  { %v68_v44 = vsel %vm64_vm4, %v52_v36, %v67_v41  ;;  %v71_v45 = vsel %vm65_vm2, %v58_v38, 920167782  ;;  %v75_v46 = vsel %vm65_vm2, %v61_v39, 1326507024  ;;  %vm29_vm0 = vcmp.eq.s32.totalorder %v28_v30, 0  ;;  %v238_v39 = vld [vmem:[#allocation2] sm:$0xff] }
  0x40   :  { %v72_v47 = vsel %vm64_vm4, %v55_v37, %v71_v45  ;;  %v76_v48 = vsel %vm64_vm4, %v58_v38, %v75_v46  ;;  %v69_v49 = vsel %vm63_vm3, %v66_v40, %v68_v44  ;;  %vm240_vm1 = vcmask 261120  }
  0x41   :  { %v73_v50 = vsel %vm63_vm3, %v70_v42, %v72_v47  ;;  %v77_v51 = vsel %vm63_vm3, %v74_v43, %v76_v48  ;;  %v85_v56 = vmul.u32 %v78_v34, %v69_v49 }
  0x42   :  { %v370_v52 = vmul.u32.u64.low %v78_v34, %v77_v51  ;;  %v371_v53 = vmul.u32.u64.high %v78_v34, %v77_v51, %v370_v52  ;;  %v373_v54 = vmul.u32.u64.low %v78_v34, %v73_v50  ;;  %v374_v55 = vmul.u32.u64.high %v78_v34, %v73_v50, %v373_v54 }
  0x44   :  { %vm87_vm5 = vc.u32 %v371_v53, %v373_v54  ;;  %v88_v57 = vadd.s32 1, %v374_v55  ;;  %v86_v6 = vadd.s32 %v373_v54, %v371_v53 }
  0x46   :  { %v89_v58 = vsel %vm87_vm5, %v88_v57, %v374_v55 }
  0x47   :  { %v90_v59 = vadd.s32 %v89_v58, %v85_v56 }
  0x49   :  { %v91_v60 = vadd.s32 536870912, %v90_v59 }
  0x4b   :  { %v92_v61 = vshrl.u32 %v91_v60, 30 }
  0x4d   :  { %v93_v62 = vshll.u32 %v92_v61, 30  ;;  %v116_v19 = vsub.s32 4, %v92_v61 }
  0x4f   :  { %v94_v63 = vsub.s32 %v90_v59, %v93_v62  ;;  %v117_v22 = vsel %vm32_vm7, %v116_v19, %v92_v61 }
  0x50   :  { %v119_v25 = vsel %vm31_vm8, 0, %v117_v22 }
  0x51   :  { %v96_v0 = vsub.s32 0, %v94_v63  ;;  %v123_v26 = vadd.s32 3, %v119_v25  ;;  %v227_v28 = vand.u32 3, %v119_v25 }
  0x53   :  { %v258_v2 = vmin.u32 %v96_v0, %v94_v63  ;;  %v124_v27 = vand.u32 3, %v123_v26  ;;  %vm232_vm10 = vcmp.eq.s32.totalorder %v227_v28, 2  ;;  %vm229_vm12 = vcmp.eq.s32.totalorder %v227_v28, 0 }
  0x54   :  { %vm228_vm14 = vcmp.lt.s32.totalorder %v227_v28, 2 }
  0x55   :  { %v98_v3 = vclz %v258_v2  ;;  %vm129_vm9 = vcmp.eq.s32.totalorder %v124_v27, 2  ;;  %vm126_vm11 = vcmp.eq.s32.totalorder %v124_v27, 0  ;;  %vm125_vm13 = vcmp.lt.s32.totalorder %v124_v27, 2 }
  0x57   :  { %v259_v4 = vadd.s32 4294967294, %v98_v3 }
  0x59   :  { %vm260_vm6 = vcmp.lt.s32.totalorder %v259_v4, 0 }
  0x5a   :  { %v101_v7 = vsel %vm260_vm6, 0, %v259_v4 }
  0x5b   :  { %v102_v9 = vsub.s32 32, %v101_v7  ;;  %v103_v10 = vshll.u32 %v94_v63, %v101_v7  ;;  %v106_v11 = vsub.s32 4294967266, %v101_v7 }
  0x5d   :  { %v104_v12 = vshrl.u32 %v86_v6, %v102_v9  ;;  %v107_v13 = vadd.s32 127, %v106_v11 }
  0x5f   :  { %v105_v14 = vor.u32 %v104_v12, %v103_v10  ;;  %v108_v15 = vshll.u32 %v107_v13, 23 }
  0x61   :  { %v109_v16 = vor.u32 4788187, %v108_v15  ;;  %v112_v17 = vcvt.s32.f32 %v105_v14 }
  0x63   :  { %v110_v18 = vand.u32 2147483647, %v109_v16 }
  0x65   :  { %v113_v20 = vmul.f32 %v112_v17, %v110_v18 }
  0x67   :  { %v114_v21 = vxor.u32 2147483648, %v113_v20 }
  0x69   :  { %v115_v23 = vsel %vm32_vm7, %v114_v21, %v113_v20 }
  0x6a   :  { %v118_v24 = vsel %vm31_vm8, %v364_v5, %v115_v23 }
  0x6b   :  { %279 = vcosq.f32 %v118_v24 }
  0x6c   :  { %281 = vsinq.f32 %v118_v24 }
  0x75   :  { %v280_v29 = vpop.eup %279 }
  0x76   :  { %v282_v31 = vpop.eup %281  ;;  %v130_v32 = vxor.u32 2147483648, %v280_v29 }
  0x77   :  { %v127_v8 = vxor.u32 2147483648, %v282_v31 }
  0x78   :  { %v131_v33 = vsel %vm129_vm9, %v130_v32, %v282_v31  ;;  %v234_v34 = vsel %vm232_vm10, %v130_v32, %v282_v31 }
  0x79   :  { %v128_v35 = vsel %vm126_vm11, %v280_v29, %v127_v8  ;;  %v231_v36 = vsel %vm229_vm12, %v280_v29, %v127_v8 }
  0x7a   :  { %v132_v37 = vsel %vm125_vm13, %v128_v35, %v131_v33  ;;  %v235_v38 = vsel %vm228_vm14, %v231_v36, %v234_v34 }
  0x7b   :  { %v133_v1 = vsel %vm122_vm15, nan, %v132_v37  ;;  %v236_v40 = vsel %vm122_vm15, nan, %v235_v38 }
  0x7c   :  { %v237_v41 = vsel %vm29_vm0, %v133_v1, %v236_v40 }
  0x7d   :  { %v239_v42 = vadd.f32 %v238_v39, %v237_v41 }
  0x7f   :  { %241 = vst.msk [vmem:[#allocation5] sm:$0xff] %vm240_vm1, %v239_v42 }
  0x80   :  { %319 = shalt.err (!%p316_p2)
}
  0x81   :  { %s320_s21 = scalar_lea.hbm %s399_s1, 128 }
  0x82   :  { %p321_p3 = scmp.ne.s32.totalorder %s399_s1, %s320_s21  ;;  %p324_p4 = scmp.lt.u32.totalorder %s320_s21, %s399_s1 }
  0x84   :  { %p326_p5 = pnand %p324_p4, %p321_p3 }
  0x86   :  { %329 = shalt.err (!%p326_p5)
}
  0x87   :  { %251 = dma.vmem_to_hbm [thread:$0]  %s249_s17, 128, %s399_s1, [#allocation4]  }
  0x88   :  { %332 = dma.done.wait [#allocation4], 128  }
  0x89   :  { %333 = vsyncadd [#allocation4], 4294967168 }
  0x8a   :  { %255 = vsyncpa [#allocation3], 1 }
  0x8b   :  { %256 = vsyncpa [#allocation4], 1 }

</bundles_post_ra>
